<compile_context>
chip_gen: v5e
topology: v5e:2x2
jax: 0.10.0
libtpu: 0.0.40
codegen_flags: <defaults>
</compile_context>

<pallas_src>
import jax
import jax.numpy as jnp
from jax.experimental import pallas as pl
from jax.experimental.pallas import tpu as pltpu


# ----------------------------- Pallas kernel --------------------------------

def _conv_bias_elu_kernel(w_ref, c_ref, b_ref, o_ref):
    # w: (M, K) bf16, c: (K, TN) bf16, b: (M, 1) f32 -> o: (M, TN) o_ref.dtype
    acc = jnp.dot(w_ref[...], c_ref[...], preferred_element_type=jnp.float32)
    acc = acc + b_ref[...]                          # bias broadcast over lanes
    elu = jnp.where(acc > 0, acc, jnp.exp(jnp.minimum(acc, 0.0)) - 1.0)
    o_ref[...] = elu.astype(o_ref.dtype)


def _round_up(x, m):
    return -(-x // m) * m


def _pick_lane_tile(n_pad, cap=1024):
    # Largest 128-multiple tile <= cap that divides the padded lane extent.
    for cand in (2048, 1024, 512, 256, 128):
        if cand <= cap and n_pad % cand == 0:
            return cand
    return 128


def conv_bias_elu(x_cbhw, w, b, *, pad=1, out_dtype=jnp.float32,
                  lane_tile_cap=1024):
    """Fused Conv2d(stride=1, padding=pad) + bias + ELU on the MXU.

    x_cbhw: (Cin, B, H, W) activations (channel-major layout), f32 or bf16.
    w:      (Cout, Cin, kh, kw) float32.
    b:      (Cout,) float32.
    Returns (Cout, B, Ho, Wo) in `out_dtype`.
    """
    Cin, B, H, W = x_cbhw.shape
    Cout, _, kh, kw = w.shape
    Ho = H + 2 * pad - kh + 1
    Wo = W + 2 * pad - kw + 1

    # im2col in bf16 (XLA glue): (Cin*kh*kw, B*Ho*Wo); lane axis = B*Ho*Wo.
    xp = jnp.pad(x_cbhw.astype(jnp.bfloat16),
                 ((0, 0), (0, 0), (pad, pad), (pad, pad)))
    taps = [xp[:, :, i:i + Ho, j:j + Wo] for i in range(kh) for j in range(kw)]
    cols = jnp.stack(taps, axis=1).reshape(Cin * kh * kw, B * Ho * Wo)

    K = Cin * kh * kw
    N = B * Ho * Wo
    M = _round_up(max(Cout, 16), 16)               # sublane-dense for f32 & bf16
    N_pad = _round_up(N, 128)                      # lane-dense output
    tn = _pick_lane_tile(N_pad, lane_tile_cap)

    cols = jnp.pad(cols, ((0, 0), (0, N_pad - N)))
    w2 = jnp.pad(w.reshape(Cout, K).astype(jnp.bfloat16),
                 ((0, M - Cout), (0, 0)))
    b2 = jnp.pad(b.astype(jnp.float32), (0, M - Cout)).reshape(M, 1)

    out = pl.pallas_call(
        _conv_bias_elu_kernel,
        grid=(N_pad // tn,),
        in_specs=[
            pl.BlockSpec((M, K), lambda j: (0, 0)),    # weight: VMEM-resident
            pl.BlockSpec((K, tn), lambda j: (0, j)),   # patches: lane tile j
            pl.BlockSpec((M, 1), lambda j: (0, 0)),    # bias: VMEM-resident
        ],
        out_specs=pl.BlockSpec((M, tn), lambda j: (0, j)),
        out_shape=jax.ShapeDtypeStruct((M, N_pad), out_dtype),
        compiler_params=pltpu.CompilerParams(
            dimension_semantics=("parallel",)),
    )(w2, cols, b2)

    return out[:Cout, :N].reshape(Cout, B, Ho, Wo)


# ------------------------------ MultConv model -------------------------------

def init_multconv_params(key, input_dim, output_dim, kernel_size,
                         recurrent_index=5):
    # Matches MultConv: every layer is Conv2d(input_dim, output_dim, k, s=1, p=1)
    # (like the PyTorch module, this only chains for recurrent_index > 1 when
    # input_dim == output_dim).
    layers = []
    for lk in jax.random.split(key, recurrent_index):
        kw_, kb_ = jax.random.split(lk)
        s = 1.0 / (input_dim * kernel_size * kernel_size) ** 0.5
        wshape = (output_dim, input_dim, kernel_size, kernel_size)
        layers.append({
            'w': jax.random.uniform(kw_, wshape, jnp.float32, -s, s),
            'b': jax.random.uniform(kb_, (output_dim,), jnp.float32, -s, s),
        })
    return {'layers': layers}


def multconv_forward(params, x):
    """x: (B, Cin, H, W) -> (B, Cout, H, W). NCHW, matching the PyTorch module."""
    h = jnp.transpose(x, (1, 0, 2, 3))             # channel-major internal layout
    n_layers = len(params['layers'])
    for li, layer in enumerate(params['layers']):
        # bf16 between layers (next layer's im2col casts to bf16 anyway);
        # float32 only for the final model output.
        dt = jnp.float32 if li == n_layers - 1 else jnp.bfloat16
        h = conv_bias_elu(h, layer['w'], layer['b'], pad=1, out_dtype=dt)
    return jnp.transpose(h, (1, 0, 2, 3))


# ------------------------------ f32 reference --------------------------------

def _multconv_reference(params, x):
    # Pure-XLA f32 reference (lax conv + bias + ELU) for validation.
    h = x
    for layer in params['layers']:
        h = jax.lax.conv_general_dilated(
            h, layer['w'], window_strides=(1, 1), padding=((1, 1), (1, 1)),
            dimension_numbers=('NCHW', 'OIHW', 'NCHW'))
        h = h + layer['b'][None, :, None, None]
        h = jnp.where(h > 0, h, jnp.exp(jnp.minimum(h, 0.0)) - 1.0)
    return h


# --------------------------------- main --------------------------------------

if __name__ == "__main__":
    input_dim = output_dim = 4
    kernel_size = 3
    recurrent_index = 5
    B, H, W = 2, 16, 16            # B*H*W = 512 lanes -> unmasked, lane-dense

    root = jax.random.PRNGKey(0)
    kp, kx = jax.random.split(root)
    params = init_multconv_params(kp, input_dim, output_dim, kernel_size,
                                  recurrent_index)
    x = jax.random.normal(kx, (B, input_dim, H, W), jnp.float32)

    fwd = jax.jit(multconv_forward)
    y = jax.block_until_ready(fwd(params, x))

    assert y.shape == (B, output_dim, H, W), y.shape
    assert bool(jnp.all(jnp.isfinite(y)))

    y_ref = _multconv_reference(params, x)
    err = float(jnp.max(jnp.abs(y - y_ref)))
    assert err < 0.15, f"max abs err vs f32 reference: {err}"

    print("KERNEL_OK")
</pallas_src>

<mosaic_0001>
module attributes {stable_mosaic.version = 11 : i64} {
  func.func @_conv_bias_elu_kernel(%arg0: i32, %arg1: memref<16x36xbf16, #tpu.memory_space<vmem>>, %arg2: memref<36x512xbf16, #tpu.memory_space<vmem>>, %arg3: memref<16x1xf32, #tpu.memory_space<vmem>>, %arg4: memref<16x512xbf16, #tpu.memory_space<vmem>>) attributes {dimension_semantics = [#tpu.dimension_semantics<parallel>], iteration_bounds = array<i64: 1>, scalar_prefetch = 0 : i64, scratch_operands = 0 : i64, tpu.core_type = #tpu.core_type<tc>, window_params = [{pipeline_mode = #tpu.pipeline_mode<synchronous>, transform_indices = @transform_0, window_bounds = array<i64: 16, 36>}, {transform_indices = @transform_1, window_bounds = array<i64: 36, 512>}, {pipeline_mode = #tpu.pipeline_mode<synchronous>, transform_indices = @transform_2, window_bounds = array<i64: 16, 1>}, {transform_indices = @transform_3, window_bounds = array<i64: 16, 512>}]} {
    %c0 = arith.constant 0 : index
    %c0_0 = arith.constant 0 : index
    %0 = vector.load %arg1[%c0, %c0_0] : memref<16x36xbf16, #tpu.memory_space<vmem>>, vector<16x36xbf16>
    %c0_1 = arith.constant 0 : index
    %c0_2 = arith.constant 0 : index
    %1 = vector.load %arg2[%c0_1, %c0_2] : memref<36x512xbf16, #tpu.memory_space<vmem>>, vector<36x512xbf16>
    %cst = arith.constant dense<0.000000e+00> : vector<16x512xf32>
    %2 = tpu.matmul %0, %1, %cst {dimension_numbers = #tpu.dot_dimension_numbers<[1], [0], [0], [1], [0, 0, 1, 1], [], []>} : vector<16x36xbf16>, vector<36x512xbf16>, vector<16x512xf32> -> vector<16x512xf32>
    %c0_3 = arith.constant 0 : index
    %c0_4 = arith.constant 0 : index
    %3 = vector.load %arg3[%c0_3, %c0_4] : memref<16x1xf32, #tpu.memory_space<vmem>>, vector<16x1xf32>
    %4 = vector.broadcast %3 : vector<16x1xf32> to vector<16x512xf32>
    %5 = arith.addf %2, %4 : vector<16x512xf32>
    %cst_5 = arith.constant 0.000000e+00 : f32
    %6 = vector.broadcast %cst_5 : f32 to vector<16x512xf32>
    %7 = arith.cmpf ogt, %5, %6 : vector<16x512xf32>
    %cst_6 = arith.constant 0.000000e+00 : f32
    %8 = vector.broadcast %cst_6 : f32 to vector<16x512xf32>
    %9 = arith.minimumf %5, %8 : vector<16x512xf32>
    %10 = math.exp %9 : vector<16x512xf32>
    %cst_7 = arith.constant 1.000000e+00 : f32
    %11 = vector.broadcast %cst_7 : f32 to vector<16x512xf32>
    %12 = arith.subf %10, %11 : vector<16x512xf32>
    %13 = arith.select %7, %5, %12 : vector<16x512xi1>, vector<16x512xf32>
    %14 = arith.truncf %13 : vector<16x512xf32> to vector<16x512xbf16>
    %c0_8 = arith.constant 0 : index
    %c0_9 = arith.constant 0 : index
    %15 = vector.load %arg4[%c0_8, %c0_9] : memref<16x512xbf16, #tpu.memory_space<vmem>>, vector<16x512xbf16>
    tpu.vector_store %arg4[%c0_8, %c0_9], %14 {strides = array<i32>} : memref<16x512xbf16, #tpu.memory_space<vmem>>, vector<16x512xbf16>,
    return
  }
  func.func @transform_0(%arg0: i32) -> (i32, i32) {
    %c0_i32 = arith.constant 0 : i32
    %c0_i32_0 = arith.constant 0 : i32
    %c0_i32_1 = arith.constant 0 : i32
    return %c0_i32, %c0_i32_0 : i32, i32
  }
  func.func @transform_1(%arg0: i32) -> (i32, i32) {
    %c0_i32 = arith.constant 0 : i32
    %c0_i32_0 = arith.constant 0 : i32
    return %c0_i32, %arg0 : i32, i32
  }
  func.func @transform_2(%arg0: i32) -> (i32, i32) {
    %c0_i32 = arith.constant 0 : i32
    %c0_i32_0 = arith.constant 0 : i32
    %c0_i32_1 = arith.constant 0 : i32
    return %c0_i32, %c0_i32_0 : i32, i32
  }
  func.func @transform_3(%arg0: i32) -> (i32, i32) {
    %c0_i32 = arith.constant 0 : i32
    %c0_i32_0 = arith.constant 0 : i32
    return %c0_i32, %arg0 : i32, i32
  }
}

module attributes {stable_mosaic.version = 11 : i64} {
  func.func @_conv_bias_elu_kernel(%arg0: i32, %arg1: memref<16x36xbf16, #tpu.memory_space<vmem>>, %arg2: memref<36x512xbf16, #tpu.memory_space<vmem>>, %arg3: memref<16x1xf32, #tpu.memory_space<vmem>>, %arg4: memref<16x512xf32, #tpu.memory_space<vmem>>) attributes {dimension_semantics = [#tpu.dimension_semantics<parallel>], iteration_bounds = array<i64: 1>, scalar_prefetch = 0 : i64, scratch_operands = 0 : i64, tpu.core_type = #tpu.core_type<tc>, window_params = [{pipeline_mode = #tpu.pipeline_mode<synchronous>, transform_indices = @transform_0, window_bounds = array<i64: 16, 36>}, {transform_indices = @transform_1, window_bounds = array<i64: 36, 512>}, {pipeline_mode = #tpu.pipeline_mode<synchronous>, transform_indices = @transform_2, window_bounds = array<i64: 16, 1>}, {transform_indices = @transform_3, window_bounds = array<i64: 16, 512>}]} {
    %c0 = arith.constant 0 : index
    %c0_0 = arith.constant 0 : index
    %0 = vector.load %arg1[%c0, %c0_0] : memref<16x36xbf16, #tpu.memory_space<vmem>>, vector<16x36xbf16>
    %c0_1 = arith.constant 0 : index
    %c0_2 = arith.constant 0 : index
    %1 = vector.load %arg2[%c0_1, %c0_2] : memref<36x512xbf16, #tpu.memory_space<vmem>>, vector<36x512xbf16>
    %cst = arith.constant dense<0.000000e+00> : vector<16x512xf32>
    %2 = tpu.matmul %0, %1, %cst {dimension_numbers = #tpu.dot_dimension_numbers<[1], [0], [0], [1], [0, 0, 1, 1], [], []>} : vector<16x36xbf16>, vector<36x512xbf16>, vector<16x512xf32> -> vector<16x512xf32>
    %c0_3 = arith.constant 0 : index
    %c0_4 = arith.constant 0 : index
    %3 = vector.load %arg3[%c0_3, %c0_4] : memref<16x1xf32, #tpu.memory_space<vmem>>, vector<16x1xf32>
    %4 = vector.broadcast %3 : vector<16x1xf32> to vector<16x512xf32>
    %5 = arith.addf %2, %4 : vector<16x512xf32>
    %cst_5 = arith.constant 0.000000e+00 : f32
    %6 = vector.broadcast %cst_5 : f32 to vector<16x512xf32>
    %7 = arith.cmpf ogt, %5, %6 : vector<16x512xf32>
    %cst_6 = arith.constant 0.000000e+00 : f32
    %8 = vector.broadcast %cst_6 : f32 to vector<16x512xf32>
    %9 = arith.minimumf %5, %8 : vector<16x512xf32>
    %10 = math.exp %9 : vector<16x512xf32>
    %cst_7 = arith.constant 1.000000e+00 : f32
    %11 = vector.broadcast %cst_7 : f32 to vector<16x512xf32>
    %12 = arith.subf %10, %11 : vector<16x512xf32>
    %13 = arith.select %7, %5, %12 : vector<16x512xi1>, vector<16x512xf32>
    %c0_8 = arith.constant 0 : index
    %c0_9 = arith.constant 0 : index
    %14 = vector.load %arg4[%c0_8, %c0_9] : memref<16x512xf32, #tpu.memory_space<vmem>>, vector<16x512xf32>
    tpu.vector_store %arg4[%c0_8, %c0_9], %13 {strides = array<i32>} : memref<16x512xf32, #tpu.memory_space<vmem>>, vector<16x512xf32>,
    return
  }
  func.func @transform_0(%arg0: i32) -> (i32, i32) {
    %c0_i32 = arith.constant 0 : i32
    %c0_i32_0 = arith.constant 0 : i32
    %c0_i32_1 = arith.constant 0 : i32
    return %c0_i32, %c0_i32_0 : i32, i32
  }
  func.func @transform_1(%arg0: i32) -> (i32, i32) {
    %c0_i32 = arith.constant 0 : i32
    %c0_i32_0 = arith.constant 0 : i32
    return %c0_i32, %arg0 : i32, i32
  }
  func.func @transform_2(%arg0: i32) -> (i32, i32) {
    %c0_i32 = arith.constant 0 : i32
    %c0_i32_0 = arith.constant 0 : i32
    %c0_i32_1 = arith.constant 0 : i32
    return %c0_i32, %c0_i32_0 : i32, i32
  }
  func.func @transform_3(%arg0: i32) -> (i32, i32) {
    %c0_i32 = arith.constant 0 : i32
    %c0_i32_0 = arith.constant 0 : i32
    return %c0_i32, %arg0 : i32, i32
  }
}

</mosaic_0001>

<bundles_post_ra>
// kernel: multconv_forward.5
= control target key start
LH: loop header
LB: loop body
LE: loop exit
PB: predicated region body
PF: predicated region fallthrough
CT: control target
= control target key end

     0   :  { %v302_v2 = vmov 0   ;;  %vm98_vm0 = vcmask 1041408   ;;  %vm94_vm1 = vcmask 293888   ;;  %s402_s1 = inlined_call_operand.vmem [shape: bf16[36,512], index: 1, kind: input, shape index: {}]   ;;  %s403_s2 = inlined_call_operand.vmem [shape: f32[16,1], index: 2, kind: input, shape index: {}]   ;;  %s404_s0 = inlined_call_operand.vmem [shape: bf16[16,36], index: 0, kind: input, shape index: {}]   ;;  %s405_s3 = inlined_call_operand.vmem [shape: bf16[16,512], index: 3, kind: output, shape index: {}]  }
   0x1   :  { %v25_v0 = vld [vmem:[%s402_s1 + $0x40] sm:$0x33]  ;;  %v26_v1 = vld [vmem:[%s402_s1 + $0x48] sm:$0x33]  ;;  %285 = vset.pattern.permute.xlu0 %v302_v2  ;;  %v282_v8 = vld [vmem:[%s402_s1 + $0x2c] sm:$0xf0] }
   0x2   :  { %v70_v3 = vunpack.c.l.b16 %v25_v0  ;;  %v71_v4 = vunpack.c.h.b16 %v25_v0  ;;  %v72_v5 = vunpack.c.l.b16 %v26_v1  ;;  %v73_v6 = vunpack.c.h.b16 %v26_v1  ;;  %v249_v7 = vld [vmem:[%s402_s1 + $0x20] sm:$0xf]  ;;  %v280_v13 = vld [vmem:[%s402_s1 + $0x24] sm:$0xf]  ;;  %v251_v14 = vld [vmem:[%s402_s1 + $0x30] sm:$0xf0] }
   0x3   :  { %v257_v15 = vld [vmem:[%s402_s1 + $0x28] sm:$0xf]  ;;  %v283_v16 = vld [vmem:[%s402_s1 + $0x34] sm:$0xf0]  ;;  %v281_v17 = vld [vmem:[%s402_s1 + $0x2c] sm:$0xf]  ;;  %v250_v23 = vor.u32 %v282_v8, %v249_v7  ;;  %v254_v24 = vor.u32 %v280_v13, %v251_v14 }
   0x4   :  { %v82_v9 = vpack.c.b16 %v70_v3, %v70_v3  ;;  %v83_v10 = vpack.c.b16 %v71_v4, %v71_v4  ;;  %v84_v11 = vpack.c.b16 %v72_v5, %v72_v5  ;;  %v85_v12 = vpack.c.b16 %v73_v6, %v73_v6  ;;  %v259_v18 = vld [vmem:[%s402_s1 + $0x38] sm:$0xf0]  ;;  %v233_v25 = vld [vmem:[%s402_s1] sm:$0xf]  ;;  %v278_v26 = vld [vmem:[%s402_s1 + $0xc] sm:$0xf0] }
   0x5   :  { %v276_v27 = vld [vmem:[%s402_s1 + $0x4] sm:$0xf]  ;;  %v258_v28 = vor.u32 %v283_v16, %v257_v15  ;;  %v262_v29 = vor.u32 %v281_v17, %v259_v18  ;;  %v235_v30 = vld [vmem:[%s402_s1 + $0x10] sm:$0xf0]  ;;  %v241_v31 = vld [vmem:[%s402_s1 + $0x8] sm:$0xf]  ;;  %v234_v36 = vor.u32 %v278_v26, %v233_v25 }
   0x6   :  { %v100_v19 = vsel %vm98_vm0, %v82_v9, 0  ;;  %v103_v20 = vsel %vm98_vm0, %v83_v10, 0  ;;  %v106_v21 = vsel %vm98_vm0, %v84_v11, 0  ;;  %v109_v22 = vsel %vm98_vm0, %v85_v12, 0  ;;  %v27_v32 = vld [vmem:[%s403_s2] sm:$0xff]  ;;  %v28_v41 = vld [vmem:[%s403_s2 + $0x8] sm:$0xff] }
   0x7   :  { %116 = vmatpush.bf16.msra.mxu0 %v100_v19  ;;  %130 = vmatpush.bf16.msra.mxu1 %v103_v20  ;;  %v279_v33 = vld [vmem:[%s402_s1 + $0x14] sm:$0xf0]  ;;  %v277_v34 = vld [vmem:[%s402_s1 + $0xc] sm:$0xf]  ;;  %v243_v35 = vld [vmem:[%s402_s1 + $0x18] sm:$0xf0]  ;;  %v238_v37 = vor.u32 %v276_v27, %v235_v30 }
   0x8   :  { %144 = vmatpush.bf16.msra.mxu2 %v106_v21  ;;  %158 = vmatpush.bf16.msra.mxu3 %v109_v22  ;;  %v242_v38 = vor.u32 %v279_v33, %v241_v31  ;;  %v246_v39 = vor.u32 %v277_v34, %v243_v35  ;;  %v275_v40 = vld [vmem:[%s404_s0] sm:$0xff] }
   0x9   :  { %31 = vperm.xlu0 %285, %v27_v32  }
   0xb   :  { %117 = vmatpush.bf16.msra.mxu0 %v250_v23  ;;  %131 = vmatpush.bf16.msra.mxu1 %v254_v24 }
   0xc   :  { %145 = vmatpush.bf16.msra.mxu2 %v258_v28  ;;  %159 = vmatpush.bf16.msra.mxu3 %v262_v29 }
   0xf   :  { %118 = vmatpush.bf16.msra.mxu0 %v234_v36  ;;  %132 = vmatpush.bf16.msra.mxu1 %v238_v37 }
  0x10   :  { %146 = vmatpush.bf16.msra.mxu2 %v242_v38  ;;  %160 = vmatpush.bf16.msra.mxu3 %v246_v39 }
  0x11   :  { %36 = vperm.xlu0 %285, %v28_v41  }
  0x12   :  { %263 = vmatmul.msk.bf16.vlgmr.msra.gmra.mxu0 %vm94_vm1, %v275_v40  ;;  %264 = vmatmul.msk.bf16.vlgmr.msra.gmra.mxu1 %vm94_vm1, %v275_v40 }
  0x13   :  { %265 = vmatmul.msk.bf16.vlgmr.msra.gmra.mxu2 %vm94_vm1, %v275_v40  ;;  %266 = vmatmul.msk.bf16.vlgmr.msra.gmra.mxu3 %vm94_vm1, %v275_v40 }
  0x7b   :  { %v32_v42 = vpop.permute.xlu0 %31 }
  0x83   :  { %v37_v51 = vpop.permute.xlu0 %36 }
  0x8f   :  { %v120_v43 = vpop.f32.mrf.mxu0  ;;  %v134_v44 = vpop.f32.mrf.mxu1 }
  0x90   :  { %v121_v45 = vadd.f32 %v120_v43, %v32_v42  ;;  %v135_v46 = vadd.f32 %v134_v44, %v32_v42 }
  0x92   :  { %v175_v47 = vmin.f32 %v121_v45, 0.0  ;;  %v176_v48 = vmin.f32 %v135_v46, 0.0  ;;  %vm167_vm2 = vcmp.gt.f32.partialorder %v121_v45, 0.0  ;;  %vm168_vm3 = vcmp.gt.f32.partialorder %v135_v46, 0.0 }
  0x94   :  { %v183_v49 = vmul.f32 1.442695, %v175_v47  ;;  %v185_v50 = vmul.f32 1.442695, %v176_v48 }
  0x96   :  { %286 = vpow2.f32 %v183_v49  ;;  %v148_v52 = vpop.f32.mrf.mxu2  ;;  %v162_v53 = vpop.f32.mrf.mxu3 }
  0x97   :  { %288 = vpow2.f32 %v185_v50  ;;  %v149_v54 = vadd.f32 %v148_v52, %v32_v42  ;;  %v163_v55 = vadd.f32 %v162_v53, %v32_v42  ;;  %v122_v56 = vpop.f32.mrf.mxu0  ;;  %v136_v57 = vpop.f32.mrf.mxu1 }
  0x98   :  { %v123_v58 = vadd.f32 %v122_v56, %v37_v51  ;;  %v137_v59 = vadd.f32 %v136_v57, %v37_v51 }
  0x99   :  { %v177_v60 = vmin.f32 %v149_v54, 0.0  ;;  %v178_v61 = vmin.f32 %v163_v55, 0.0  ;;  %vm169_vm4 = vcmp.gt.f32.partialorder %v149_v54, 0.0  ;;  %vm170_vm5 = vcmp.gt.f32.partialorder %v163_v55, 0.0 }
  0x9a   :  { %v179_v62 = vmin.f32 %v123_v58, 0.0  ;;  %v180_v63 = vmin.f32 %v137_v59, 0.0  ;;  %vm171_vm6 = vcmp.gt.f32.partialorder %v123_v58, 0.0  ;;  %vm172_vm7 = vcmp.gt.f32.partialorder %v137_v59, 0.0 }
  0x9b   :  { %v187_v0 = vmul.f32 1.442695, %v177_v60  ;;  %v189_v1 = vmul.f32 1.442695, %v178_v61 }
  0x9c   :  { %v287_v2 = vpop.eup %286  ;;  %v191_v3 = vmul.f32 1.442695, %v179_v62  ;;  %v193_v4 = vmul.f32 1.442695, %v180_v63 }
  0x9d   :  { %v289_v5 = vpop.eup %288  ;;  %v267_v6 = vadd.f32 -1.0, %v287_v2  ;;  %290 = vpow2.f32 %v187_v0 }
  0x9e   :  { %v268_v7 = vadd.f32 -1.0, %v289_v5  ;;  %292 = vpow2.f32 %v189_v1  ;;  %v150_v8 = vpop.f32.mrf.mxu2  ;;  %v164_v9 = vpop.f32.mrf.mxu3 }
  0x9f   :  { %v207_v10 = vsel %vm167_vm2, %v121_v45, %v267_v6  ;;  %294 = vpow2.f32 %v191_v3  ;;  %v151_v11 = vadd.f32 %v150_v8, %v37_v51  ;;  %v165_v12 = vadd.f32 %v164_v9, %v37_v51 }
  0xa0   :  { %v208_v13 = vsel %vm168_vm3, %v135_v46, %v268_v7  ;;  %296 = vpow2.f32 %v193_v4 }
  0xa1   :  { %v215_v14 = vpack.c.bf16 %v208_v13, %v207_v10  ;;  %v181_v15 = vmin.f32 %v151_v11, 0.0  ;;  %v182_v16 = vmin.f32 %v165_v12, 0.0  ;;  %vm173_vm8 = vcmp.gt.f32.partialorder %v151_v11, 0.0 }
  0xa2   :  { %vm174_vm9 = vcmp.gt.f32.partialorder %v165_v12, 0.0 }
  0xa3   :  { %v291_v17 = vpop.eup %290  ;;  %219 = vst [vmem:[%s405_s3] sm:$0xff] %v215_v14  ;;  %v195_v18 = vmul.f32 1.442695, %v181_v15  ;;  %v197_v21 = vmul.f32 1.442695, %v182_v16 }
  0xa4   :  { %v293_v19 = vpop.eup %292  ;;  %v269_v20 = vadd.f32 -1.0, %v291_v17 }
  0xa5   :  { %v295_v22 = vpop.eup %294  ;;  %v270_v23 = vadd.f32 -1.0, %v293_v19  ;;  %298 = vpow2.f32 %v195_v18 }
  0xa6   :  { %v297_v24 = vpop.eup %296  ;;  %v209_v25 = vsel %vm169_vm4, %v149_v54, %v269_v20  ;;  %v271_v26 = vadd.f32 -1.0, %v295_v22  ;;  %300 = vpow2.f32 %v197_v21 }
  0xa7   :  { %v210_v27 = vsel %vm170_vm5, %v163_v55, %v270_v23  ;;  %v272_v28 = vadd.f32 -1.0, %v297_v24 }
  0xa8   :  { %v216_v29 = vpack.c.bf16 %v210_v27, %v209_v25  ;;  %v211_v30 = vsel %vm171_vm6, %v123_v58, %v271_v26 }
  0xa9   :  { %v212_v31 = vsel %vm172_vm7, %v137_v59, %v272_v28 }
  0xaa   :  { %220 = vst [vmem:[%s405_s3 + $0x8] sm:$0xff] %v216_v29  ;;  %v217_v32 = vpack.c.bf16 %v212_v31, %v211_v30 }
  0xab   :  { %v299_v33 = vpop.eup %298 }
  0xac   :  { %v301_v34 = vpop.eup %300  ;;  %221 = vst [vmem:[%s405_s3 + $0x10] sm:$0xff] %v217_v32  ;;  %v273_v35 = vadd.f32 -1.0, %v299_v33 }
  0xad   :  { %v274_v36 = vadd.f32 -1.0, %v301_v34 }
  0xae   :  { %v213_v37 = vsel %vm173_vm8, %v151_v11, %v273_v35 }
  0xaf   :  { %v214_v38 = vsel %vm174_vm9, %v165_v12, %v274_v36 }
  0xb0   :  { %v218_v39 = vpack.c.bf16 %v214_v38, %v213_v37 }
  0xb2   :  { %222 = vst [vmem:[%s405_s3 + $0x18] sm:$0xff] %v218_v39 }

// kernel: multconv_forward.9
= control target key start
LH: loop header
LB: loop body
LE: loop exit
PB: predicated region body
PF: predicated region fallthrough
CT: control target
= control target key end

     0   :  { %v302_v2 = vmov 0   ;;  %vm98_vm0 = vcmask 1041408   ;;  %vm94_vm1 = vcmask 293888   ;;  %s414_s1 = inlined_call_operand.vmem [shape: bf16[36,512], index: 1, kind: input, shape index: {}]   ;;  %s415_s2 = inlined_call_operand.vmem [shape: f32[16,1], index: 2, kind: input, shape index: {}]   ;;  %s416_s0 = inlined_call_operand.vmem [shape: bf16[16,36], index: 0, kind: input, shape index: {}]   ;;  %s417_s3 = inlined_call_operand.vmem [shape: f32[16,512], index: 3, kind: output, shape index: {}]  }
   0x1   :  { %v25_v0 = vld [vmem:[%s414_s1 + $0x40] sm:$0x33]  ;;  %v26_v1 = vld [vmem:[%s414_s1 + $0x48] sm:$0x33]  ;;  %285 = vset.pattern.permute.xlu0 %v302_v2  ;;  %v282_v8 = vld [vmem:[%s414_s1 + $0x2c] sm:$0xf0] }
   0x2   :  { %v70_v3 = vunpack.c.l.b16 %v25_v0  ;;  %v71_v4 = vunpack.c.h.b16 %v25_v0  ;;  %v72_v5 = vunpack.c.l.b16 %v26_v1  ;;  %v73_v6 = vunpack.c.h.b16 %v26_v1  ;;  %v249_v7 = vld [vmem:[%s414_s1 + $0x20] sm:$0xf]  ;;  %v280_v13 = vld [vmem:[%s414_s1 + $0x24] sm:$0xf]  ;;  %v251_v14 = vld [vmem:[%s414_s1 + $0x30] sm:$0xf0] }
   0x3   :  { %v257_v15 = vld [vmem:[%s414_s1 + $0x28] sm:$0xf]  ;;  %v283_v16 = vld [vmem:[%s414_s1 + $0x34] sm:$0xf0]  ;;  %v281_v17 = vld [vmem:[%s414_s1 + $0x2c] sm:$0xf]  ;;  %v250_v23 = vor.u32 %v282_v8, %v249_v7  ;;  %v254_v24 = vor.u32 %v280_v13, %v251_v14 }
   0x4   :  { %v82_v9 = vpack.c.b16 %v70_v3, %v70_v3  ;;  %v83_v10 = vpack.c.b16 %v71_v4, %v71_v4  ;;  %v84_v11 = vpack.c.b16 %v72_v5, %v72_v5  ;;  %v85_v12 = vpack.c.b16 %v73_v6, %v73_v6  ;;  %v259_v18 = vld [vmem:[%s414_s1 + $0x38] sm:$0xf0]  ;;  %v233_v25 = vld [vmem:[%s414_s1] sm:$0xf]  ;;  %v278_v26 = vld [vmem:[%s414_s1 + $0xc] sm:$0xf0] }
   0x5   :  { %v276_v27 = vld [vmem:[%s414_s1 + $0x4] sm:$0xf]  ;;  %v258_v28 = vor.u32 %v283_v16, %v257_v15  ;;  %v262_v29 = vor.u32 %v281_v17, %v259_v18  ;;  %v235_v30 = vld [vmem:[%s414_s1 + $0x10] sm:$0xf0]  ;;  %v241_v31 = vld [vmem:[%s414_s1 + $0x8] sm:$0xf]  ;;  %v234_v36 = vor.u32 %v278_v26, %v233_v25 }
   0x6   :  { %v100_v19 = vsel %vm98_vm0, %v82_v9, 0  ;;  %v103_v20 = vsel %vm98_vm0, %v83_v10, 0  ;;  %v106_v21 = vsel %vm98_vm0, %v84_v11, 0  ;;  %v109_v22 = vsel %vm98_vm0, %v85_v12, 0  ;;  %v27_v32 = vld [vmem:[%s415_s2] sm:$0xff]  ;;  %v28_v41 = vld [vmem:[%s415_s2 + $0x8] sm:$0xff] }
   0x7   :  { %116 = vmatpush.bf16.msra.mxu0 %v100_v19  ;;  %130 = vmatpush.bf16.msra.mxu1 %v103_v20  ;;  %v279_v33 = vld [vmem:[%s414_s1 + $0x14] sm:$0xf0]  ;;  %v277_v34 = vld [vmem:[%s414_s1 + $0xc] sm:$0xf]  ;;  %v243_v35 = vld [vmem:[%s414_s1 + $0x18] sm:$0xf0]  ;;  %v238_v37 = vor.u32 %v276_v27, %v235_v30 }
   0x8   :  { %144 = vmatpush.bf16.msra.mxu2 %v106_v21  ;;  %158 = vmatpush.bf16.msra.mxu3 %v109_v22  ;;  %v242_v38 = vor.u32 %v279_v33, %v241_v31  ;;  %v246_v39 = vor.u32 %v277_v34, %v243_v35  ;;  %v275_v40 = vld [vmem:[%s416_s0] sm:$0xff] }
   0x9   :  { %31 = vperm.xlu0 %285, %v27_v32  }
   0xb   :  { %117 = vmatpush.bf16.msra.mxu0 %v250_v23  ;;  %131 = vmatpush.bf16.msra.mxu1 %v254_v24 }
   0xc   :  { %145 = vmatpush.bf16.msra.mxu2 %v258_v28  ;;  %159 = vmatpush.bf16.msra.mxu3 %v262_v29 }
   0xf   :  { %118 = vmatpush.bf16.msra.mxu0 %v234_v36  ;;  %132 = vmatpush.bf16.msra.mxu1 %v238_v37 }
  0x10   :  { %146 = vmatpush.bf16.msra.mxu2 %v242_v38  ;;  %160 = vmatpush.bf16.msra.mxu3 %v246_v39 }
  0x11   :  { %36 = vperm.xlu0 %285, %v28_v41  }
  0x12   :  { %263 = vmatmul.msk.bf16.vlgmr.msra.gmra.mxu0 %vm94_vm1, %v275_v40  ;;  %264 = vmatmul.msk.bf16.vlgmr.msra.gmra.mxu1 %vm94_vm1, %v275_v40 }
  0x13   :  { %265 = vmatmul.msk.bf16.vlgmr.msra.gmra.mxu2 %vm94_vm1, %v275_v40  ;;  %266 = vmatmul.msk.bf16.vlgmr.msra.gmra.mxu3 %vm94_vm1, %v275_v40 }
  0x7b   :  { %v32_v42 = vpop.permute.xlu0 %31 }
  0x83   :  { %v37_v51 = vpop.permute.xlu0 %36 }
  0x8f   :  { %v120_v43 = vpop.f32.mrf.mxu0  ;;  %v134_v44 = vpop.f32.mrf.mxu1 }
  0x90   :  { %v121_v45 = vadd.f32 %v120_v43, %v32_v42  ;;  %v135_v46 = vadd.f32 %v134_v44, %v32_v42 }
  0x92   :  { %v175_v47 = vmin.f32 %v121_v45, 0.0  ;;  %v176_v48 = vmin.f32 %v135_v46, 0.0  ;;  %vm167_vm2 = vcmp.gt.f32.partialorder %v121_v45, 0.0  ;;  %vm168_vm3 = vcmp.gt.f32.partialorder %v135_v46, 0.0 }
  0x94   :  { %v183_v49 = vmul.f32 1.442695, %v175_v47  ;;  %v185_v50 = vmul.f32 1.442695, %v176_v48 }
  0x96   :  { %286 = vpow2.f32 %v183_v49  ;;  %v148_v52 = vpop.f32.mrf.mxu2  ;;  %v162_v53 = vpop.f32.mrf.mxu3 }
  0x97   :  { %288 = vpow2.f32 %v185_v50  ;;  %v149_v54 = vadd.f32 %v148_v52, %v32_v42  ;;  %v163_v55 = vadd.f32 %v162_v53, %v32_v42  ;;  %v122_v56 = vpop.f32.mrf.mxu0  ;;  %v136_v57 = vpop.f32.mrf.mxu1 }
  0x98   :  { %v123_v58 = vadd.f32 %v122_v56, %v37_v51  ;;  %v137_v59 = vadd.f32 %v136_v57, %v37_v51 }
  0x99   :  { %v177_v60 = vmin.f32 %v149_v54, 0.0  ;;  %v178_v61 = vmin.f32 %v163_v55, 0.0  ;;  %vm169_vm4 = vcmp.gt.f32.partialorder %v149_v54, 0.0  ;;  %vm170_vm5 = vcmp.gt.f32.partialorder %v163_v55, 0.0 }
  0x9a   :  { %v179_v62 = vmin.f32 %v123_v58, 0.0  ;;  %v180_v63 = vmin.f32 %v137_v59, 0.0  ;;  %vm171_vm6 = vcmp.gt.f32.partialorder %v123_v58, 0.0  ;;  %vm172_vm7 = vcmp.gt.f32.partialorder %v137_v59, 0.0 }
  0x9b   :  { %v187_v0 = vmul.f32 1.442695, %v177_v60  ;;  %v189_v1 = vmul.f32 1.442695, %v178_v61 }
  0x9c   :  { %v287_v2 = vpop.eup %286  ;;  %v191_v3 = vmul.f32 1.442695, %v179_v62  ;;  %v193_v4 = vmul.f32 1.442695, %v180_v63 }
  0x9d   :  { %v289_v5 = vpop.eup %288  ;;  %v267_v6 = vadd.f32 -1.0, %v287_v2  ;;  %290 = vpow2.f32 %v187_v0 }
  0x9e   :  { %v268_v7 = vadd.f32 -1.0, %v289_v5  ;;  %292 = vpow2.f32 %v189_v1  ;;  %v150_v8 = vpop.f32.mrf.mxu2  ;;  %v164_v9 = vpop.f32.mrf.mxu3 }
  0x9f   :  { %v207_v10 = vsel %vm167_vm2, %v121_v45, %v267_v6  ;;  %294 = vpow2.f32 %v191_v3  ;;  %v151_v11 = vadd.f32 %v150_v8, %v37_v51  ;;  %v165_v12 = vadd.f32 %v164_v9, %v37_v51 }
  0xa0   :  { %215 = vst [vmem:[%s417_s3] sm:$0xff] %v207_v10  ;;  %v208_v13 = vsel %vm168_vm3, %v135_v46, %v268_v7  ;;  %296 = vpow2.f32 %v193_v4 }
  0xa1   :  { %216 = vst [vmem:[%s417_s3 + $0x8] sm:$0xff] %v208_v13  ;;  %v181_v14 = vmin.f32 %v151_v11, 0.0  ;;  %v182_v15 = vmin.f32 %v165_v12, 0.0  ;;  %vm173_vm8 = vcmp.gt.f32.partialorder %v151_v11, 0.0  ;;  %vm174_vm9 = vcmp.gt.f32.partialorder %v165_v12, 0.0 }
  0xa3   :  { %v291_v16 = vpop.eup %290  ;;  %v195_v17 = vmul.f32 1.442695, %v181_v14  ;;  %v197_v18 = vmul.f32 1.442695, %v182_v15 }
  0xa4   :  { %v293_v19 = vpop.eup %292  ;;  %v269_v20 = vadd.f32 -1.0, %v291_v16 }
  0xa5   :  { %v295_v21 = vpop.eup %294  ;;  %v270_v22 = vadd.f32 -1.0, %v293_v19  ;;  %298 = vpow2.f32 %v195_v17 }
  0xa6   :  { %v297_v23 = vpop.eup %296  ;;  %v209_v24 = vsel %vm169_vm4, %v149_v54, %v269_v20  ;;  %v271_v25 = vadd.f32 -1.0, %v295_v21  ;;  %300 = vpow2.f32 %v197_v18 }
  0xa7   :  { %217 = vst [vmem:[%s417_s3 + $0x10] sm:$0xff] %v209_v24  ;;  %v210_v26 = vsel %vm170_vm5, %v163_v55, %v270_v22  ;;  %v272_v27 = vadd.f32 -1.0, %v297_v23 }
  0xa8   :  { %218 = vst [vmem:[%s417_s3 + $0x18] sm:$0xff] %v210_v26  ;;  %v211_v28 = vsel %vm171_vm6, %v123_v58, %v271_v25 }
  0xa9   :  { %219 = vst [vmem:[%s417_s3 + $0x20] sm:$0xff] %v211_v28  ;;  %v212_v29 = vsel %vm172_vm7, %v137_v59, %v272_v27 }
  0xaa   :  { %220 = vst [vmem:[%s417_s3 + $0x28] sm:$0xff] %v212_v29 }
  0xab   :  { %v299_v30 = vpop.eup %298 }
  0xac   :  { %v301_v31 = vpop.eup %300  ;;  %v273_v32 = vadd.f32 -1.0, %v299_v30 }
  0xad   :  { %v274_v33 = vadd.f32 -1.0, %v301_v31 }
  0xae   :  { %v213_v34 = vsel %vm173_vm8, %v151_v11, %v273_v32 }
  0xaf   :  { %221 = vst [vmem:[%s417_s3 + $0x30] sm:$0xff] %v213_v34  ;;  %v214_v35 = vsel %vm174_vm9, %v165_v12, %v274_v33 }
  0xb0   :  { %222 = vst [vmem:[%s417_s3 + $0x38] sm:$0xff] %v214_v35 }

</bundles_post_ra>
